<compile_context>
chip_gen: v6e
topology: v6e:2x2x1
jax: 0.10.0
libtpu: 0.0.40
codegen_flags: <defaults>
</compile_context>

<pallas_src>
import functools

import jax
import jax.numpy as jnp
from jax.experimental import pallas as pl
from jax.experimental.pallas import tpu as pltpu  # noqa: F401  (TPU backend)


# ----------------------------------------------------------------------------
# Fused kernel: causal additive mask + padding mask in one launch
# ----------------------------------------------------------------------------
def _mask_kernel(target_ref, causal_ref, pad_ref, *, pad_idx):
    t = causal_ref.shape[0]

    # Causal mask. Reference chain:
    #   triu(ones) == 1  -> transpose -> float -> fill(0 -> -inf, 1 -> 0)
    # which is exactly: mask[i, j] = 0.0 if j <= i else -inf
    row = jax.lax.broadcasted_iota(jnp.int32, (t, t), 0)
    col = jax.lax.broadcasted_iota(jnp.int32, (t, t), 1)
    causal_ref[...] = jnp.where(col <= row,
                                jnp.float32(0.0),
                                jnp.float32(-jnp.inf))

    # Padding mask: target == pad_idx. Stored as int32 inside the kernel
    # (i1 vector stores are awkward on Mosaic); cast to bool in the wrapper.
    pad_ref[...] = (target_ref[...] == pad_idx).astype(jnp.int32)


def mask_forward(target, pad_idx: int):
    """Equivalent of Mask(device, pad_idx).forward(target)."""
    b, t = target.shape
    causal, pad_i32 = pl.pallas_call(
        functools.partial(_mask_kernel, pad_idx=pad_idx),
        out_shape=(
            jax.ShapeDtypeStruct((t, t), jnp.float32),  # additive causal mask
            jax.ShapeDtypeStruct((b, t), jnp.int32),    # padding mask (0/1)
        ),
    )(target)
    return causal, pad_i32.astype(jnp.bool_)


# ----------------------------------------------------------------------------
if __name__ == "__main__":
    B, T = 2, 8
    PAD_IDX = 0

    key = jax.random.PRNGKey(0)
    target = jax.random.randint(key, (B, T), minval=0, maxval=5, dtype=jnp.int32)

    fwd = jax.jit(functools.partial(mask_forward, pad_idx=PAD_IDX))
    causal, pad_mask = fwd(target)
    causal, pad_mask = jax.block_until_ready((causal, pad_mask))

    # Pure-jnp reference of the PyTorch semantics.
    ref_causal = jnp.where(
        jnp.transpose(jnp.triu(jnp.ones((T, T), jnp.float32))) == 1.0,
        jnp.float32(0.0), jnp.float32(-jnp.inf))
    ref_pad = target == PAD_IDX

    assert causal.shape == (T, T) and causal.dtype == jnp.float32, causal.shape
    assert pad_mask.shape == (B, T) and pad_mask.dtype == jnp.bool_, pad_mask.shape
    assert bool(jnp.all(causal == ref_causal))
    assert bool(jnp.all(pad_mask == ref_pad))
    print("KERNEL_OK")
</pallas_src>

<mosaic_0001>
module attributes {stable_mosaic.version = 11 : i64} {
  func.func @_mask_kernel(%arg0: memref<2x8xi32, #tpu.memory_space<vmem>>, %arg1: memref<8x8xf32, #tpu.memory_space<vmem>>, %arg2: memref<2x8xi32, #tpu.memory_space<vmem>>) attributes {dimension_semantics = [], scalar_prefetch = 0 : i64, scratch_operands = 0 : i64, tpu.core_type = #tpu.core_type<tc>} {
    %0 = tpu.iota {dimensions = array<i32: 0>} : vector<8x8xi32>
    %1 = tpu.iota {dimensions = array<i32: 1>} : vector<8x8xi32>
    %2 = arith.cmpi sle, %1, %0 : vector<8x8xi32>
    %cst = arith.constant 0.000000e+00 : f32
    %cst_0 = arith.constant 0xFF800000 : f32
    %3 = vector.broadcast %cst : f32 to vector<8x8xf32>
    %4 = vector.broadcast %cst_0 : f32 to vector<8x8xf32>
    %5 = arith.select %2, %3, %4 : vector<8x8xi1>, vector<8x8xf32>
    %c0 = arith.constant 0 : index
    %c0_1 = arith.constant 0 : index
    %6 = vector.load %arg1[%c0, %c0_1] : memref<8x8xf32, #tpu.memory_space<vmem>>, vector<8x8xf32>
    tpu.vector_store %arg1[%c0, %c0_1], %5 {strides = array<i32>} : memref<8x8xf32, #tpu.memory_space<vmem>>, vector<8x8xf32>,
    %c0_2 = arith.constant 0 : index
    %c0_3 = arith.constant 0 : index
    %7 = vector.load %arg0[%c0_2, %c0_3] : memref<2x8xi32, #tpu.memory_space<vmem>>, vector<2x8xi32>
    %c0_i32 = arith.constant 0 : i32
    %8 = vector.broadcast %c0_i32 : i32 to vector<2x8xi32>
    %9 = arith.cmpi eq, %7, %8 : vector<2x8xi32>
    %10 = arith.extui %9 : vector<2x8xi1> to vector<2x8xi32>
    %c0_4 = arith.constant 0 : index
    %c0_5 = arith.constant 0 : index
    %11 = vector.load %arg2[%c0_4, %c0_5] : memref<2x8xi32, #tpu.memory_space<vmem>>, vector<2x8xi32>
    tpu.vector_store %arg2[%c0_4, %c0_5], %10 {strides = array<i32>} : memref<2x8xi32, #tpu.memory_space<vmem>>, vector<2x8xi32>,
    return
  }
}

</mosaic_0001>

<bundles_post_ra>
// kernel: mask_forward.1
= control target key start
LH: loop header
LB: loop body
LE: loop exit
PB: predicated region body
PF: predicated region fallthrough
CT: control target
= control target key end

     0   :  { %8 = vsyncpa [#allocation3], 0  ;;  %s131_s0 = inlined_call_operand.hbm [shape: s32[2,8], index: 0, kind: input, shape index: {}]   ;;  %s132_s1 = inlined_call_operand.hbm [shape: f32[8,8], index: 1, kind: output, shape index: {0}]   ;;  %s133_s2 = inlined_call_operand.vmem [shape: s32[2,8], index: 2, kind: output, shape index: {1}]  }
   0x1   :  { %9 = vsyncpa [#allocation4], 0  ;;  %s103_s9 = smov [#allocation2]  }
   0x2   :  { %s16_s10 = sshll.u32 %s103_s9, 4  ;;  %s17_s10 = int_to_ptr.vmem [resolvable:$true] %s16_s10 }
   0x3   :  { %s67_s11 = scalar_lea.vmem %s17_s10, 32  ;;  %p72_p1 = scmp.lt.s32.totalorder %s17_s10, %s17_s10 }
   0x4   :  { %p68_p0 = scmp.ne.s32.totalorder %s17_s10, %s67_s11  ;;  %p73_p2 = scmp.lt.s32.totalorder %s67_s11, %s67_s11 }
   0x6   :  { %p74_p3 = por %p73_p2, %p72_p1 }
   0x8   :  { %p75_p4 = pnand %p74_p3, %p68_p0 }
   0xa   :  { %78 = shalt.err (!%p75_p4)
}
   0xb   :  { %19 = dma.hbm_to_vmem [thread:$0]  %s131_s0, 32, %s17_s10, [#allocation3]  }
   0xc   :  { %99 = dma.done.wait [#allocation3], 32  }
   0xd   :  { %100 = vsyncadd [#allocation3], 4294967264  ;;  %v23_v0 = vlaneseq  ;;  %s104_s14 = smov [#allocation5]   ;;  %vm29_vm0 = vcmask 64512   ;;  %v105_v3 = vmov -inf   ;;  %vm34_vm2 = vcmask 58368  }
   0xe   :  { %s42_s15 = sshll.u32 %s104_s14, 4  ;;  %v31_v5 = vld [vmem:[#allocation2] sm:$0x3]  ;;  %s43_s15 = int_to_ptr.vmem [resolvable:$true] %s42_s15 }
   0xf   :  { %v24_v1 = vshrl.u32 %v23_v0, 7  ;;  %v26_v2 = vand.u32 127, %v23_v0  ;;  %s79_s16 = scalar_lea.vmem %s43_s15, 128  ;;  %p84_p6 = scmp.lt.s32.totalorder %s43_s15, %s43_s15 }
  0x10   :  { %p80_p5 = scmp.ne.s32.totalorder %s43_s15, %s79_s16  ;;  %p85_p7 = scmp.lt.s32.totalorder %s79_s16, %s79_s16 }
  0x11   :  { %vm27_vm1 = vcmp.le.s32.totalorder %v26_v2, %v24_v1 }
  0x12   :  { %v28_v4 = vsel %vm27_vm1, 0.0, %v105_v3  ;;  %p86_p8 = por %p85_p7, %p84_p6 }
  0x13   :  { %30 = vst.msk [vmem:[#allocation5] sm:$0xff] %vm29_vm0, %v28_v4 }
  0x14   :  { %p87_p9 = pnand %p86_p8, %p80_p5 }
  0x16   :  { %90 = shalt.err (!%p87_p9)
}
  0x17   :  { %45 = dma.vmem_to_hbm [thread:$0]  %s43_s15, 128, %s132_s1, [#allocation4]   ;;  %vm32_vm3 = vcmp.eq.s32.totalorder %v31_v5, 0  ;;  %v106_v6 = vmov 0  }
  0x18   :  { %v33_v7 = vsel %vm32_vm3, 1, %v106_v6 }
  0x19   :  { %35 = vst.msk [vmem:[%s133_s2] sm:$0x3] %vm34_vm2, %v33_v7 }
  0x1a   :  { %101 = dma.done.wait [#allocation4], 128  }
  0x1b   :  { %102 = vsyncadd [#allocation4], 4294967168 }
  0x1c   :  { %53 = vsyncpa [#allocation3], 1 }
  0x1d   :  { %54 = vsyncpa [#allocation4], 1 }

</bundles_post_ra>
